<compile_context>
chip_gen: v7x
topology: tpu7x:2x2x1
jax: 0.10.0
libtpu: 0.0.40
codegen_flags: <defaults>
</compile_context>

<pallas_src>
import functools

import jax
import jax.numpy as jnp
import numpy as np
from jax.experimental import pallas as pl
from jax.experimental.pallas import tpu as pltpu


def _round_up(x: int, m: int) -> int:
    return (x + m - 1) // m * m


def _conv_stats_kernel(w_ref, p_ref, y_ref, sum_ref, ssq_ref):
    """Phase 1: conv tile (one matmul) + per-tile per-channel sum / sum-of-squares.

    w_ref:   (Cout, Kc)    folded conv weights (f32 or bf16)
    p_ref:   (Kc, Tm)      transposed-im2col tile (f32 or bf16)
    y_ref:   (Cout, Tm)    conv output tile, f32, lane-dense
    sum_ref: (1, Cout, 1)  per-tile channel sums (f32)
    ssq_ref: (1, Cout, 1)  per-tile channel sums of squares (f32)
    """
    acc = jnp.dot(w_ref[...], p_ref[...], preferred_element_type=jnp.float32)
    y_ref[...] = acc
    sum_ref[0] = jnp.sum(acc, axis=1, keepdims=True)
    ssq_ref[0] = jnp.sum(acc * acc, axis=1, keepdims=True)


def _bn_prelu_kernel(scale_ref, shift_ref, alpha_ref, y_ref, o_ref):
    """Phase 2: fused BatchNorm affine + PReLU on a lane-dense (Cout, Tm) tile.

    scale_ref/shift_ref: (Cout, 1) f32, broadcast along lanes
    alpha_ref:           (1,) f32 in SMEM (shared PReLU slope)
    y_ref/o_ref:         (Cout, Tm) f32
    """
    y = y_ref[...] * scale_ref[...] + shift_ref[...]
    alpha = alpha_ref[0]
    o_ref[...] = jnp.where(y > 0, y, alpha * y)


def upsampling_block(x_nchw, weight_oihw, gamma, beta, alpha, *,
                     padding=1, upscale_factor=2, eps=1e-5,
                     tile_m=512, matmul_dtype=jnp.bfloat16):
    """Forward pass of UpsamplingBlock. Input/output NCHW (PyTorch convention).

    Conv stride is fixed at 1 (the module default). BatchNorm uses training-mode
    batch statistics (biased variance), matching a freshly constructed module.
    """
    N, Cin, H, W = x_nchw.shape
    Cout, _, KH, KW = weight_oihw.shape
    r = upscale_factor
    assert Cout % (r * r) == 0, "PixelShuffle requires Cout divisible by r^2"

    Ho = H + 2 * padding - KH + 1   # stride = 1
    Wo = W + 2 * padding - KW + 1
    M = N * Ho * Wo
    Kc = KH * KW * Cin

    # ---- wrapper glue (pure layout): transposed im2col P^T of shape (Kc, M) ----
    x_nhwc = jnp.transpose(x_nchw, (0, 2, 3, 1)).astype(matmul_dtype)
    x_pad = jnp.pad(x_nhwc, ((0, 0), (padding, padding), (padding, padding), (0, 0)))
    taps = [x_pad[:, kh:kh + Ho, kw:kw + Wo, :]
            for kh in range(KH) for kw in range(KW)]              # each (N,Ho,Wo,Cin)
    pt = jnp.stack(taps, axis=0)                                   # (KH*KW, N,Ho,Wo,Cin)
    pt = jnp.transpose(pt, (0, 4, 1, 2, 3)).reshape(Kc, M)         # k=(kh,kw,ci), m=(n,h,w)

    # Conv weights folded to (Cout, Kc) with the matching (kh, kw, ci) k-order.
    w2 = (jnp.transpose(weight_oihw, (0, 2, 3, 1))
          .reshape(Cout, Kc).astype(matmul_dtype))

    # Pixel tiling: lane-dense tiles (multiple of 128); pad M with zero columns
    # (zero columns contribute nothing to the stats and are sliced off at the end).
    tm = min(_round_up(tile_m, 128), _round_up(M, 128))
    m_pad = _round_up(M, tm)
    num_tiles = m_pad // tm
    if m_pad != M:
        pt = jnp.pad(pt, ((0, 0), (0, m_pad - M)))

    # ---- phase 1: conv (single K=Kc matmul per tile) + per-tile channel stats ----
    itemsize = pt.dtype.itemsize
    cost1 = pl.CostEstimate(
        flops=2 * Cout * Kc * m_pad, transcendentals=0,
        bytes_accessed=(Kc * m_pad + Cout * Kc) * itemsize + Cout * m_pad * 4)
    conv_cm, psum, pssq = pl.pallas_call(
        _conv_stats_kernel,
        out_shape=(
            jax.ShapeDtypeStruct((Cout, m_pad), jnp.float32),        # conv^T, lane-dense
            jax.ShapeDtypeStruct((num_tiles, Cout, 1), jnp.float32),
            jax.ShapeDtypeStruct((num_tiles, Cout, 1), jnp.float32),
        ),
        grid=(num_tiles,),
        in_specs=[
            pl.BlockSpec((Cout, Kc), lambda i: (0, 0)),
            pl.BlockSpec((Kc, tm), lambda i: (0, i)),
        ],
        out_specs=(
            pl.BlockSpec((Cout, tm), lambda i: (0, i)),
            pl.BlockSpec((1, Cout, 1), lambda i: (i, 0, 0)),
            pl.BlockSpec((1, Cout, 1), lambda i: (i, 0, 0)),
        ),
        compiler_params=pltpu.CompilerParams(dimension_semantics=("parallel",)),
        cost_estimate=cost1,
    )(w2, pt)

    # ---- tiny plain-JAX finalize of global BN statistics -> per-channel scale/shift ----
    ch_sum = jnp.sum(psum[:, :, 0], axis=0)              # (Cout,)
    ch_ssq = jnp.sum(pssq[:, :, 0], axis=0)              # (Cout,)
    mean = ch_sum / M
    var = jnp.maximum(ch_ssq / M - mean * mean, 0.0)      # biased variance
    scale = gamma.astype(jnp.float32) * jax.lax.rsqrt(var + eps)
    shift = beta.astype(jnp.float32) - mean * scale
    scale_col = scale.reshape(Cout, 1)
    shift_col = shift.reshape(Cout, 1)
    alpha1 = jnp.asarray(alpha, jnp.float32).reshape(1)

    # ---- phase 2: fused BatchNorm affine + PReLU, lane-dense elementwise ----
    cost2 = pl.CostEstimate(flops=4 * Cout * m_pad, transcendentals=0,
                            bytes_accessed=2 * Cout * m_pad * 4)
    y_cm = pl.pallas_call(
        _bn_prelu_kernel,
        out_shape=jax.ShapeDtypeStruct((Cout, m_pad), jnp.float32),
        grid=(num_tiles,),
        in_specs=[
            pl.BlockSpec((Cout, 1), lambda i: (0, 0)),
            pl.BlockSpec((Cout, 1), lambda i: (0, 0)),
            pl.BlockSpec(memory_space=pltpu.MemorySpace.SMEM),
            pl.BlockSpec((Cout, tm), lambda i: (0, i)),
        ],
        out_specs=pl.BlockSpec((Cout, tm), lambda i: (0, i)),
        compiler_params=pltpu.CompilerParams(dimension_semantics=("parallel",)),
        cost_estimate=cost2,
    )(scale_col, shift_col, alpha1, conv_cm)

    # ---- wrapper glue: channel-major -> NCHW, then the PixelShuffle permutation ----
    y_nchw = jnp.transpose(y_cm[:, :M].reshape(Cout, N, Ho, Wo), (1, 0, 2, 3))
    C = Cout // (r * r)
    y = y_nchw.reshape(N, C, r, r, Ho, Wo)
    y = jnp.transpose(y, (0, 1, 4, 2, 5, 3))
    return y.reshape(N, C, Ho * r, Wo * r)


def _reference(x_nchw, weight_oihw, gamma, beta, alpha, *,
               padding=1, upscale_factor=2, eps=1e-5):
    """Pure-JAX reference matching the PyTorch forward semantics (f32)."""
    y = jax.lax.conv_general_dilated(
        x_nchw.astype(jnp.float32), weight_oihw.astype(jnp.float32),
        window_strides=(1, 1), padding=((padding, padding), (padding, padding)),
        dimension_numbers=("NCHW", "OIHW", "NCHW"))
    mean = jnp.mean(y, axis=(0, 2, 3), keepdims=True)
    var = jnp.mean((y - mean) ** 2, axis=(0, 2, 3), keepdims=True)
    y = (y - mean) * jax.lax.rsqrt(var + eps)
    y = y * gamma.reshape(1, -1, 1, 1) + beta.reshape(1, -1, 1, 1)
    N, Cout, H, W = y.shape
    r = upscale_factor
    C = Cout // (r * r)
    y = y.reshape(N, C, r, r, H, W).transpose(0, 1, 4, 2, 5, 3).reshape(N, C, H * r, W * r)
    return jnp.where(y > 0, y, alpha * y)


if __name__ == "__main__":
    # Shapes consistent with the module: in_channels=4, out_channels=8,
    # kernel_size=3, padding=1, upscale_factor=2 (8 % 2^2 == 0).
    N, Cin, H, W = 2, 4, 16, 16
    Cout, K, r = 8, 3, 2

    key = jax.random.PRNGKey(0)
    kx, kw, kg, kb = jax.random.split(key, 4)
    x = jax.random.normal(kx, (N, Cin, H, W), dtype=jnp.float32)
    weight = 0.1 * jax.random.normal(kw, (Cout, Cin, K, K), dtype=jnp.float32)  # bias=False
    gamma = 1.0 + 0.1 * jax.random.normal(kg, (Cout,), dtype=jnp.float32)       # BN weight
    beta = 0.1 * jax.random.normal(kb, (Cout,), dtype=jnp.float32)              # BN bias
    alpha = jnp.float32(0.25)                                                   # PReLU default

    ref = jax.block_until_ready(
        _reference(x, weight, gamma, beta, alpha, padding=1, upscale_factor=r))

    # Exact-semantics path: f32 MXU operands, tight tolerance (4 pixel tiles).
    fwd_f32 = jax.jit(functools.partial(
        upsampling_block, padding=1, upscale_factor=r, tile_m=128,
        matmul_dtype=jnp.float32))
    out_f32 = jax.block_until_ready(fwd_f32(x, weight, gamma, beta, alpha))
    assert out_f32.shape == (N, Cout // (r * r), H * r, W * r), out_f32.shape
    np.testing.assert_allclose(np.asarray(out_f32), np.asarray(ref),
                               atol=1e-3, rtol=1e-3)

    # MXU fast path (per review, v6e/v7x): bf16 operands, f32 accumulation.
    fwd_bf16 = jax.jit(functools.partial(
        upsampling_block, padding=1, upscale_factor=r, tile_m=128,
        matmul_dtype=jnp.bfloat16))
    out_bf16 = jax.block_until_ready(fwd_bf16(x, weight, gamma, beta, alpha))
    np.testing.assert_allclose(np.asarray(out_bf16), np.asarray(ref),
                               atol=2e-2, rtol=2e-2)

    print("KERNEL_OK")
</pallas_src>

<mosaic_0001>
module attributes {stable_mosaic.version = 11 : i64} {
  func.func @_bn_prelu_kernel(%arg0: i32, %arg1: memref<8x1xf32, #tpu.memory_space<vmem>>, %arg2: memref<8x1xf32, #tpu.memory_space<vmem>>, %arg3: memref<1xf32, #tpu.memory_space<smem>>, %arg4: memref<8x128xf32, #tpu.memory_space<vmem>>, %arg5: memref<8x128xf32, #tpu.memory_space<vmem>>) attributes {dimension_semantics = [#tpu.dimension_semantics<parallel>], iteration_bounds = array<i64: 4>, scalar_prefetch = 0 : i64, scratch_operands = 0 : i64, tpu.core_type = #tpu.core_type<tc>, window_params = [{pipeline_mode = #tpu.pipeline_mode<synchronous>, transform_indices = @transform_0, window_bounds = array<i64: 8, 1>}, {pipeline_mode = #tpu.pipeline_mode<synchronous>, transform_indices = @transform_1, window_bounds = array<i64: 8, 1>}, {transform_indices = @transform_2, window_bounds = array<i64: 1>}, {transform_indices = @transform_3, window_bounds = array<i64: 8, 128>}, {transform_indices = @transform_4, window_bounds = array<i64: 8, 128>}]} {
    %c0 = arith.constant 0 : index
    %c0_0 = arith.constant 0 : index
    %0 = vector.load %arg4[%c0, %c0_0] : memref<8x128xf32, #tpu.memory_space<vmem>>, vector<8x128xf32>
    %c0_1 = arith.constant 0 : index
    %c0_2 = arith.constant 0 : index
    %1 = vector.load %arg1[%c0_1, %c0_2] : memref<8x1xf32, #tpu.memory_space<vmem>>, vector<8x1xf32>
    %2 = vector.broadcast %1 : vector<8x1xf32> to vector<8x128xf32>
    %3 = arith.mulf %0, %2 : vector<8x128xf32>
    %c0_3 = arith.constant 0 : index
    %c0_4 = arith.constant 0 : index
    %4 = vector.load %arg2[%c0_3, %c0_4] : memref<8x1xf32, #tpu.memory_space<vmem>>, vector<8x1xf32>
    %5 = vector.broadcast %4 : vector<8x1xf32> to vector<8x128xf32>
    %6 = arith.addf %3, %5 : vector<8x128xf32>
    %c0_5 = arith.constant 0 : index
    %7 = memref.load %arg3[%c0_5] : memref<1xf32, #tpu.memory_space<smem>>
    %cst = arith.constant 0.000000e+00 : f32
    %8 = vector.broadcast %cst : f32 to vector<8x128xf32>
    %9 = arith.cmpf ogt, %6, %8 : vector<8x128xf32>
    %10 = vector.broadcast %7 : f32 to vector<8x128xf32>
    %11 = arith.mulf %10, %6 : vector<8x128xf32>
    %12 = arith.select %9, %6, %11 : vector<8x128xi1>, vector<8x128xf32>
    %c0_6 = arith.constant 0 : index
    %c0_7 = arith.constant 0 : index
    %13 = vector.load %arg5[%c0_6, %c0_7] : memref<8x128xf32, #tpu.memory_space<vmem>>, vector<8x128xf32>
    tpu.vector_store %arg5[%c0_6, %c0_7], %12 {strides = array<i32>} : memref<8x128xf32, #tpu.memory_space<vmem>>, vector<8x128xf32>,
    return
  }
  func.func @transform_0(%arg0: i32) -> (i32, i32) {
    %c0_i32 = arith.constant 0 : i32
    %c0_i32_0 = arith.constant 0 : i32
    %c0_i32_1 = arith.constant 0 : i32
    return %c0_i32, %c0_i32_0 : i32, i32
  }
  func.func @transform_1(%arg0: i32) -> (i32, i32) {
    %c0_i32 = arith.constant 0 : i32
    %c0_i32_0 = arith.constant 0 : i32
    %c0_i32_1 = arith.constant 0 : i32
    return %c0_i32, %c0_i32_0 : i32, i32
  }
  func.func @transform_2(%arg0: i32) -> i32 {
    %c0_i32 = arith.constant 0 : i32
    %c0_i32_0 = arith.constant 0 : i32
    return %c0_i32 : i32
  }
  func.func @transform_3(%arg0: i32) -> (i32, i32) {
    %c0_i32 = arith.constant 0 : i32
    %c0_i32_0 = arith.constant 0 : i32
    return %c0_i32, %arg0 : i32, i32
  }
  func.func @transform_4(%arg0: i32) -> (i32, i32) {
    %c0_i32 = arith.constant 0 : i32
    %c0_i32_0 = arith.constant 0 : i32
    return %c0_i32, %arg0 : i32, i32
  }
}

module attributes {stable_mosaic.version = 11 : i64} {
  func.func @_conv_stats_kernel(%arg0: i32, %arg1: memref<8x36xf32, #tpu.memory_space<vmem>>, %arg2: memref<36x128xf32, #tpu.memory_space<vmem>>, %arg3: memref<8x128xf32, #tpu.memory_space<vmem>>, %arg4: memref<1x8x1xf32, #tpu.memory_space<vmem>>, %arg5: memref<1x8x1xf32, #tpu.memory_space<vmem>>) attributes {dimension_semantics = [#tpu.dimension_semantics<parallel>], iteration_bounds = array<i64: 4>, scalar_prefetch = 0 : i64, scratch_operands = 0 : i64, tpu.core_type = #tpu.core_type<tc>, window_params = [{pipeline_mode = #tpu.pipeline_mode<synchronous>, transform_indices = @transform_0, window_bounds = array<i64: 8, 36>}, {transform_indices = @transform_1, window_bounds = array<i64: 36, 128>}, {transform_indices = @transform_2, window_bounds = array<i64: 8, 128>}, {transform_indices = @transform_3, window_bounds = array<i64: 1, 8, 1>}, {transform_indices = @transform_4, window_bounds = array<i64: 1, 8, 1>}]} {
    %c0 = arith.constant 0 : index
    %c0_0 = arith.constant 0 : index
    %0 = vector.load %arg1[%c0, %c0_0] : memref<8x36xf32, #tpu.memory_space<vmem>>, vector<8x36xf32>
    %c0_1 = arith.constant 0 : index
    %c0_2 = arith.constant 0 : index
    %1 = vector.load %arg2[%c0_1, %c0_2] : memref<36x128xf32, #tpu.memory_space<vmem>>, vector<36x128xf32>
    %cst = arith.constant dense<0.000000e+00> : vector<8x128xf32>
    %2 = tpu.matmul %0, %1, %cst {dimension_numbers = #tpu.dot_dimension_numbers<[1], [0], [0], [1], [0, 0, 1, 1], [], []>} : vector<8x36xf32>, vector<36x128xf32>, vector<8x128xf32> -> vector<8x128xf32>
    %c0_3 = arith.constant 0 : index
    %c0_4 = arith.constant 0 : index
    %3 = vector.load %arg3[%c0_3, %c0_4] : memref<8x128xf32, #tpu.memory_space<vmem>>, vector<8x128xf32>
    tpu.vector_store %arg3[%c0_3, %c0_4], %2 {strides = array<i32>} : memref<8x128xf32, #tpu.memory_space<vmem>>, vector<8x128xf32>,
    %cst_5 = arith.constant dense<0.000000e+00> : vector<8xf32>
    %4 = vector.multi_reduction <add>, %2, %cst_5 [1] : vector<8x128xf32> to vector<8xf32>
    %5 = vector.shape_cast %4 : vector<8xf32> to vector<8x1xf32>
    %c0_6 = arith.constant 0 : index
    %c0_7 = arith.constant 0 : index
    %c0_8 = arith.constant 0 : index
    %6 = vector.load %arg4[%c0_6, %c0_7, %c0_8] : memref<1x8x1xf32, #tpu.memory_space<vmem>>, vector<1x8x1xf32>
    %7 = vector.shape_cast %6 : vector<1x8x1xf32> to vector<8x1xf32>
    %8 = vector.shape_cast %5 : vector<8x1xf32> to vector<1x8x1xf32>
    tpu.vector_store %arg4[%c0_6, %c0_7, %c0_8], %8 {strides = array<i32>} : memref<1x8x1xf32, #tpu.memory_space<vmem>>, vector<1x8x1xf32>,
    %9 = arith.mulf %2, %2 : vector<8x128xf32>
    %cst_9 = arith.constant dense<0.000000e+00> : vector<8xf32>
    %10 = vector.multi_reduction <add>, %9, %cst_9 [1] : vector<8x128xf32> to vector<8xf32>
    %11 = vector.shape_cast %10 : vector<8xf32> to vector<8x1xf32>
    %c0_10 = arith.constant 0 : index
    %c0_11 = arith.constant 0 : index
    %c0_12 = arith.constant 0 : index
    %12 = vector.load %arg5[%c0_10, %c0_11, %c0_12] : memref<1x8x1xf32, #tpu.memory_space<vmem>>, vector<1x8x1xf32>
    %13 = vector.shape_cast %12 : vector<1x8x1xf32> to vector<8x1xf32>
    %14 = vector.shape_cast %11 : vector<8x1xf32> to vector<1x8x1xf32>
    tpu.vector_store %arg5[%c0_10, %c0_11, %c0_12], %14 {strides = array<i32>} : memref<1x8x1xf32, #tpu.memory_space<vmem>>, vector<1x8x1xf32>,
    return
  }
  func.func @transform_0(%arg0: i32) -> (i32, i32) {
    %c0_i32 = arith.constant 0 : i32
    %c0_i32_0 = arith.constant 0 : i32
    %c0_i32_1 = arith.constant 0 : i32
    return %c0_i32, %c0_i32_0 : i32, i32
  }
  func.func @transform_1(%arg0: i32) -> (i32, i32) {
    %c0_i32 = arith.constant 0 : i32
    %c0_i32_0 = arith.constant 0 : i32
    return %c0_i32, %arg0 : i32, i32
  }
  func.func @transform_2(%arg0: i32) -> (i32, i32) {
    %c0_i32 = arith.constant 0 : i32
    %c0_i32_0 = arith.constant 0 : i32
    return %c0_i32, %arg0 : i32, i32
  }
  func.func @transform_3(%arg0: i32) -> (i32, i32, i32) {
    %c0_i32 = arith.constant 0 : i32
    %c0_i32_0 = arith.constant 0 : i32
    %c0_i32_1 = arith.constant 0 : i32
    return %arg0, %c0_i32, %c0_i32_0 : i32, i32, i32
  }
  func.func @transform_4(%arg0: i32) -> (i32, i32, i32) {
    %c0_i32 = arith.constant 0 : i32
    %c0_i32_0 = arith.constant 0 : i32
    %c0_i32_1 = arith.constant 0 : i32
    return %arg0, %c0_i32, %c0_i32_0 : i32, i32, i32
  }
}

</mosaic_0001>

<bundles_post_ra>
// kernel: upsampling_block.2
= control target key start
LH: loop header
LB: loop body
LE: loop exit
PB: predicated region body
PF: predicated region fallthrough
CT: control target
= control target key end

     0   :  { %s600_s15 = smov 0   ;;  %s602_s16 = smov 0   ;;  %s663_s0 = inlined_call_operand.vmem [shape: f32[8,36], index: 0, kind: input, shape index: {}]   ;;  %s664_s1 = inlined_call_operand.vmem [shape: f32[36,512], index: 1, kind: input, shape index: {}]   ;;  %s665_s2 = inlined_call_operand.vmem [shape: f32[8,512], index: 2, kind: output, shape index: {0}]   ;;  %s666_s3 = inlined_call_operand.vmem [shape: f32[4,8,1], index: 3, kind: output, shape index: {1}]   ;;  %s667_s4 = inlined_call_operand.vmem [shape: f32[4,8,1], index: 4, kind: output, shape index: {2}]  }
   0x1   :  { %s604_s17 = smov 0  }
   0x2 LB: > { %s481_s18 = sadd.s32 4294967295, %s570_s17   ;;  %s617_s19 = sadd.s32 1, %s570_s17   ;;  %s570_s17 = sphi %s604_s17, %s670_s17   ;;  %s566_s16 = sphi %s602_s16, %s669_s16   ;;  %s562_s15 = sphi %s600_s15, %s668_s15  }
   0x3   : > { %s40_s20 = ssub.s32 %s570_s17, %s617_s19  ;;  %s43_s21 = sadd.s32 1, %s566_s16 }
   0x4   : > { %p41_p0 = scmp.eq.s32.totalorder %s40_s20, 0  ;;  %p50_p1 = scmp.ne.s32.totalorder %s566_s16, %s562_s15 }
   0x5   : > { %p51_p2 = scmp.eq.s32.totalorder %s570_s17, 0  ;;  %p484_p4 = scmp.ge.s32.totalorder %s570_s17, 4 }
   0x6   : > { %s626_s22 = scalar_select %p41_p0, %s566_s16, %s43_s21  }
   0x7   : > { %p52_p3 = por %p51_p2, %p50_p1  ;;  %157 = sbr.rel (%p484_p4) target bundleno = 23 (0x17), region = 20 }
   0xe   : > { %160 = sbr.rel (!%p52_p3) target bundleno = 23 (0x17), region = 24  ;;  %s162_s23 = sand.u32 (%p52_p3), 1, %s566_s16  }
   0xf   : > { %s485_s24 = sshll.u32 (%p52_p3), %s570_s17, 3  ;;  %s519_s25 = smul.u32 (%p52_p3), 40, %s162_s23 }
  0x10   : > { %s166_s28 = scalar_lea.vmem (%p52_p3), %s664_s1, %s485_s24 }
  0x11   : > { %v202_v0 = vld [vmem:[%s166_s28] sm:$0xff] (%p52_p3)  ;;  %s164_s29 = scalar_lea.vmem (%p52_p3), [#allocation2], %s519_s25 }
  0x12   : > { %v204_v1 = vld [vmem:[%s166_s28 + $0x20] sm:$0xff] (%p52_p3)  ;;  %203 = vst [vmem:[%s164_s29] sm:$0xff] (%p52_p3), %v202_v0 }
  0x13   : > { %v206_v2 = vld [vmem:[%s166_s28 + $0x40] sm:$0xff] (%p52_p3)  ;;  %205 = vst [vmem:[%s164_s29 + $0x8] sm:$0xff] (%p52_p3), %v204_v1 }
  0x14   : > { %v208_v3 = vld [vmem:[%s166_s28 + $0x60] sm:$0xff] (%p52_p3)  ;;  %207 = vst [vmem:[%s164_s29 + $0x10] sm:$0xff] (%p52_p3), %v206_v2 }
  0x15   : > { %v210_v4 = vld [vmem:[%s166_s28 + $0x80] sm:$0xff]  ;;  %209 = vst [vmem:[%s164_s29 + $0x18] sm:$0xff] %v208_v3 }
  0x16   : > { %211 = vst [vmem:[%s164_s29 + $0x20] sm:$0xff] %v210_v4 }
  0x17 PF: > { %p486_p5 = scmp.ge.s32.totalorder %s570_s17, 1  ;;  %p216_p6 = scmp.lt.s32.totalorder %s570_s17, 5 }
  0x19   : > { %p217_p7 = pnand %p486_p5, %p216_p6 }
  0x1a   : > { %s223_s30 = sand.u32 (!%p217_p7), 1, %s562_s15   ;;  %v572_v5 = vmov (!%p217_p7), 0.0|0.0   ;;  %vm573_vm0 = vmmov (!%p217_p7), 0   ;;  %v574_v6 = vmov (!%p217_p7), 0.0   ;;  %vm277_vm1 = vcmask (!%p217_p7), 1043456   ;;  %v267_v14 = vld [vmem:[%s663_s0] sm:$0xff] (!%p217_p7) }
  0x1b   : > { %220 = sbr.rel (%p217_p7) target bundleno = 402 (0x192), region = 62  ;;  %513 = vmatprep.subr.bf16.mxu0 (!%p217_p7), %v572_v5  ;;  %510 = vmatprep.mubr.msk.f32.mxu0 (!%p217_p7), %vm573_vm0, %v574_v6  ;;  %vm273_vm2 = vcmask (!%p217_p7), 293888   ;;  %p255_p8 = scmp.lt.s32.totalorder (!%p217_p7), %s481_s18, 3  ;;  %vm354_vm3 = vcmask (!%p217_p7), 7168  }
  0x1c   : > { %s520_s5 = smul.u32 (!%p217_p7), 40, %s223_s30 }
  0x1e   : > { %s225_s6 = scalar_lea.vmem (!%p217_p7), [#allocation2], %s520_s5 }
  0x1f   : > { %v268_v7 = vld [vmem:[%s225_s6] sm:$0xff] (!%p217_p7)  ;;  %v269_v8 = vld [vmem:[%s225_s6 + $0x8] sm:$0xff] (!%p217_p7)  ;;  %v270_v9 = vld [vmem:[%s225_s6 + $0x10] sm:$0xff] (!%p217_p7) }
  0x20   : > { %v514_v10 = vpack.c.bf16 (!%p217_p7), %v269_v8, %v268_v7  ;;  %v271_v11 = vld [vmem:[%s225_s6 + $0x18] sm:$0xff] (!%p217_p7)  ;;  %v272_v13 = vld [vmem:[%s225_s6 + $0x20] sm:$0xf] (!%p217_p7) }
  0x21   : > { %v517_v12 = vpack.c.bf16 (!%p217_p7), %v271_v11, %v270_v9 }
  0x22   : > { %515 = vmatpush3.bf16.msra.mxu0 %v514_v10  ;;  %s672_s18 = smov (!%p255_p8, %s481_s18), 3 }
  0x23   : > { %516 = vmatprep.subr.bf16.mxu0 %v572_v5  ;;  %s487_s9 = sshll.u32 %s672_s18, 3 }
  0x24   : > { %s258_s12 = scalar_lea.vmem %s665_s2, %s487_s9  ;;  %s262_s15 = scalar_lea.vmem %s666_s3, %s487_s9 }
  0x25   : > { %s266_s18 = scalar_lea.vmem %s667_s4, %s487_s9 }
  0x26   : > { %518 = vmatpush3.bf16.msra.mxu0 %v517_v12 }
  0x27   : > { %508 = vmatprep.subr.mxu0 %v574_v6 }
  0x2a   : > { %509 = vmatpush3.msk.msra.mxu0 %vm277_vm1, %v272_v13 }
  0x2b   : > { %511 = vmatmul.mubr.msk.f32.vlgmr.msra.gmra.mrb[0].mxu0 %vm273_vm2, %v267_v14 }
  0xfe   : > { %v347_v15 = vpop.f32.mrb[0].mxu0 }
  0xff   : > { %351 = vst [vmem:[%s258_s12] sm:$0xff] %v347_v15  ;;  %352 = vadd.xlane.f32.xlu0 %v347_v15  ;;  %v512_v16 = vpop.f32.mrb[1].mxu0  ;;  %v356_v17 = vmul.f32 %v347_v15, %v347_v15 }
 0x103   : > { %357 = vadd.xlane.f32.xlu0 %v356_v17 }
 0x18c   : > { %v353_v18 = vpop.xlane.xlu0 %352 }
 0x18d   : > { %355 = vst.msk [vmem:[%s262_s15] sm:$0xff] %vm354_vm3, %v353_v18 }
 0x190   : > { %v358_v19 = vpop.xlane.xlu0 %357 }
 0x191   : > { %359 = vst.msk [vmem:[%s266_s18] sm:$0xff] %vm354_vm3, %v358_v19 }
 0x192 PF: > { %p12_p9 = scmp.ge.s32.totalorder %s617_s19, 6   ;;  %s668_s15 = smov %s566_s16 }
 0x193   : > { %s669_s16 = smov %s626_s22  ;;  %s670_s17 = smov %s617_s19 }
 0x194   :  { %14 = sbr.rel (!%p12_p9) target bundleno = 2 (0x2), region = 125 }

// kernel: upsampling_block.3
= control target key start
LH: loop header
LB: loop body
LE: loop exit
PB: predicated region body
PF: predicated region fallthrough
CT: control target
= control target key end

     0   :  { %s324_s17 = smov 0   ;;  %s347_s0 = inlined_call_operand.vmem [shape: f32[8,1], index: 0, kind: input, shape index: {}]   ;;  %s348_s1 = inlined_call_operand.vmem [shape: f32[8,1], index: 1, kind: input, shape index: {}]   ;;  %s349_s2 = inlined_call_operand.<no memory space> [shape: f32[1], index: 2, kind: input, shape index: {}]   ;;  %s350_s3 = inlined_call_operand.vmem [shape: f32[8,512], index: 3, kind: input, shape index: {}]   ;;  %s351_s4 = inlined_call_operand.vmem [shape: f32[8,512], index: 4, kind: output, shape index: {}]  }
   0x1   :  { %9 = sst [smem:[#allocation2]] %s349_s2 }
   0x2 LB: > { %s268_s18 = sadd.s32 4294967295, %s293_s17   ;;  %p272_p0 = scmp.ge.s32.totalorder %s293_s17, 1  ;;  %s293_s17 = sphi %s324_s17, %s15_s17  }
   0x3   : > { %p162_p1 = scmp.lt.s32.totalorder %s293_s17, 5 }
   0x5   : > { %p163_p2 = pnand %p272_p0, %p162_p1 }
   0x6   : > { %v195_v0 = vld [vmem:[%s347_s0] sm:$0xff] (!%p163_p2)  ;;  %v295_v1 = vmov (!%p163_p2), 0   ;;  %p186_p3 = scmp.lt.s32.totalorder (!%p163_p2), %s268_s18, 3  ;;  %s209_s23 = sld [smem:[#allocation2]] (!%p163_p2) }
   0x7   : > { %166 = sbr.rel (%p163_p2) target bundleno = 146 (0x92), region = 36  ;;  %286 = vset.pattern.permute.xlu0 (!%p163_p2), %v295_v1  ;;  %v202_v2 = vld [vmem:[%s348_s1] sm:$0xff] (!%p163_p2) }
   0x8   : > { %198 = vperm.xlu0 (!%p163_p2), %286, %v195_v0  }
   0xc   : > { %205 = vperm.xlu0 (!%p163_p2), %286, %v202_v2   ;;  %v211_v6 = vstv (!%p163_p2), %s209_s23 }
   0xe   : > { %s353_s18 = smov (!%p186_p3, %s268_s18), 3 }
   0xf   : > { %s273_s22 = sshll.u32 %s353_s18, 3 }
  0x10   : > { %s189_s26 = scalar_lea.vmem %s350_s3, %s273_s22  ;;  %s193_s29 = scalar_lea.vmem %s351_s4, %s273_s22 }
  0x11   : > { %v194_v4 = vld [vmem:[%s189_s26] sm:$0xff] }
  0x87   : > { %v199_v3 = vpop.permute.xlu0 %198 }
  0x88   : > { %v201_v5 = vmul.f32 %v199_v3, %v194_v4 }
  0x8b   : > { %v206_v7 = vpop.permute.xlu0 %205 }
  0x8c   : > { %v208_v8 = vadd.f32 %v206_v7, %v201_v5 }
  0x8e   : > { %vm210_vm0 = vcmp.gt.f32.partialorder %v208_v8, 0.0  ;;  %v212_v9 = vmul.f32 %v211_v6, %v208_v8 }
  0x90   : > { %v213_v10 = vsel %vm210_vm0, %v208_v8, %v212_v9 }
  0x91   : > { %214 = vst [vmem:[%s193_s29] sm:$0xff] %v213_v10 }
  0x92 PF: > { %s15_s17 = sadd.s32 1, %s293_s17  }
  0x93   : > { %p12_p4 = scmp.ge.s32.totalorder %s15_s17, 6  }
  0x95   :  { %14 = sbr.rel (!%p12_p4) target bundleno = 2 (0x2), region = 66 }

</bundles_post_ra>
